<compile_context>
chip_gen: v7x
topology: tpu7x:2x2x1
jax: 0.10.0
libtpu: 0.0.40
codegen_flags: <defaults>
</compile_context>

<pallas_src>
import math

import jax
import jax.numpy as jnp
from jax import lax
from jax.experimental import pallas as pl
from jax.experimental.pallas import tpu as pltpu

# ---------------------------------------------------------------------------
# Model hyper-parameters (small, deterministic, consistent with the module)
# ---------------------------------------------------------------------------
NUM_NODES = 16      # number of molecules in the relation graph
INP_DIM = 32        # opt.args['FPSize'] (map_layer == 0)
HIDDEN_DIM = 32     # opt.args['rel_hidden_dim']
NUM_CLASSES = 8     # opt.args['ClassNum']
NUM_PERS = 4        # opt.args['rel_num_pers']
RES_ALPHA = 0.5     # opt.args['rel_res']
UPDATE_ADJ_RATIO = 0.5
NUM_REL_LAYERS = 2  # opt.args['rel_layer']

OUT_PAD = 128       # lane-dense output width (>= NUM_CLASSES, multiple of 128)


# ---------------------------------------------------------------------------
# Fused kernel: graph_learn -> GCN -> refine(graph_learn + mix + GCN) -> head
# ---------------------------------------------------------------------------
def _fpsimnet_kernel(x_ref, gl1_ref, gl2_ref, gw1_ref, gw2_ref,
                     fc1w_ref, fc1b_ref, fc2w_ref, fc2b_ref, out_ref):
    x = x_ref[...]                                   # (N, D) node features
    n = x.shape[0]

    # identity for graph_include_self — built once, reused by both learners
    row = lax.broadcasted_iota(jnp.int32, (n, n), 0)
    col = lax.broadcasted_iota(jnp.int32, (n, n), 1)
    eye = jnp.where(row == col, 1.0, 0.0).astype(jnp.float32)

    inv_pers = 1.0 / NUM_PERS

    def learn(feat, w_all):
        # w_all is the 4 perspectives concatenated along the output axis
        # (D, NUM_PERS*HIDDEN): relu(feat @ w_all) holds all perspective
        # projections side by side; contracting the 128-wide last dim of h
        # with itself sums the per-perspective Gram matrices.
        h = jnp.maximum(
            jnp.dot(feat, w_all, preferred_element_type=jnp.float32), 0.0)
        raw = lax.dot_general(
            h, h, dimension_numbers=(((1,), (1,)), ((), ())),
            preferred_element_type=jnp.float32) * inv_pers
        # learn_graph: adj = softmax(raw_adj, dim=-1) (numerically stable)
        m = jnp.max(raw, axis=-1, keepdims=True)
        e = jnp.exp(raw - m)
        adj = e / jnp.sum(e, axis=-1, keepdims=True)
        # graph_skip_conn == 0 and graph_include_self -> adj = adj + I
        return adj + eye

    def gcn(feat, adj):
        # layer 1: relu(adj @ (feat @ W1))   (dropout is identity in eval)
        h = jnp.dot(adj,
                    jnp.dot(feat, gw1_ref[...],
                            preferred_element_type=jnp.float32),
                    preferred_element_type=jnp.float32)
        h = jnp.maximum(h, 0.0)
        # layer 2 (last GCN layer, no activation): adj @ (h @ W2)
        return jnp.dot(adj,
                       jnp.dot(h, gw2_ref[...],
                               preferred_element_type=jnp.float32),
                       preferred_element_type=jnp.float32)

    # learn_graph(graph_learner1, init_node_vec)
    first_adj = learn(x, gl1_ref[...])
    # encoder(init_node_vec, cur_adj) — first call uses first_adj directly
    node_vec = gcn(x, first_adj)

    # refinement loop: range(num_layers - 1), statically unrolled
    for _ in range(NUM_REL_LAYERS - 1):
        cur_adj = learn(node_vec, gl2_ref[...])
        adj = (UPDATE_ADJ_RATIO * cur_adj
               + (1.0 - UPDATE_ADJ_RATIO) * first_adj)
        node_vec = gcn(x, adj)

    # head: fc1 -> residual (res_alpha) -> fc2 (lane-padded to OUT_PAD)
    h = jnp.dot(node_vec, fc1w_ref[...],
                preferred_element_type=jnp.float32) + fc1b_ref[...]
    h = RES_ALPHA * x + h
    out_ref[...] = jnp.dot(h, fc2w_ref[...],
                           preferred_element_type=jnp.float32) + fc2b_ref[...]


def fpsimnet_forward(features, params):
    n, d = features.shape

    # Collapse the per-perspective weights into a single lane-dense matrix:
    # W_all[:, p*H:(p+1)*H] == W_p, so x @ W_all == concat_p(x @ W_p).
    gl1_all = jnp.transpose(params["gl1_w"], (1, 0, 2)).reshape(
        INP_DIM, NUM_PERS * HIDDEN_DIM)
    gl2_all = jnp.transpose(params["gl2_w"], (1, 0, 2)).reshape(
        HIDDEN_DIM, NUM_PERS * HIDDEN_DIM)

    # Pad fc2 to 128 output lanes so the kernel's final store is unmasked.
    fc2_w_pad = jnp.zeros((INP_DIM, OUT_PAD), jnp.float32)
    fc2_w_pad = fc2_w_pad.at[:, :NUM_CLASSES].set(params["fc2_w"])
    fc2_b_pad = jnp.zeros((1, OUT_PAD), jnp.float32)
    fc2_b_pad = fc2_b_pad.at[:, :NUM_CLASSES].set(params["fc2_b"])

    vmem = pl.BlockSpec(memory_space=pltpu.MemorySpace.VMEM)

    out = pl.pallas_call(
        _fpsimnet_kernel,
        out_shape=jax.ShapeDtypeStruct((n, OUT_PAD), jnp.float32),
        in_specs=[vmem] * 9,
        out_specs=vmem,
    )(features, gl1_all, gl2_all,
      params["gcn_w1"], params["gcn_w2"],
      params["fc1_w"], params["fc1_b"], fc2_w_pad, fc2_b_pad)

    return out[:, :NUM_CLASSES]


# ---------------------------------------------------------------------------
# Pure-JAX reference (for a sanity check)
# ---------------------------------------------------------------------------
def fpsimnet_reference(features, params):
    def learn(x, ws):
        acc = 0.0
        for p in range(ws.shape[0]):
            h = jax.nn.relu(x @ ws[p])
            acc = acc + h @ h.T
        raw = acc / ws.shape[0]
        adj = jax.nn.softmax(raw, axis=-1)
        return adj + jnp.eye(x.shape[0], dtype=jnp.float32)

    def gcn(x, adj, w1, w2):
        h = jax.nn.relu(adj @ (x @ w1))
        return adj @ (h @ w2)

    first_adj = learn(features, params["gl1_w"])
    node_vec = gcn(features, first_adj, params["gcn_w1"], params["gcn_w2"])
    for _ in range(NUM_REL_LAYERS - 1):
        cur_adj = learn(node_vec, params["gl2_w"])
        cur_adj = (UPDATE_ADJ_RATIO * cur_adj
                   + (1.0 - UPDATE_ADJ_RATIO) * first_adj)
        node_vec = gcn(features, cur_adj, params["gcn_w1"], params["gcn_w2"])
    h = node_vec @ params["fc1_w"] + params["fc1_b"]
    h = RES_ALPHA * features + h
    return h @ params["fc2_w"] + params["fc2_b"]


# ---------------------------------------------------------------------------
# Deterministic parameter init (xavier-uniform style, kept as (in, out) mats)
# ---------------------------------------------------------------------------
def _xavier(key, shape, fan_in, fan_out):
    bound = math.sqrt(6.0 / (fan_in + fan_out))
    return jax.random.uniform(key, shape, jnp.float32, -bound, bound)


def make_params(key):
    ks = jax.random.split(key, 8)
    return {
        # GraphLearner1 / GraphLearner2: num_pers stacked (in, hidden) matrices
        "gl1_w": _xavier(ks[0], (NUM_PERS, INP_DIM, HIDDEN_DIM), INP_DIM, HIDDEN_DIM),
        "gl2_w": _xavier(ks[1], (NUM_PERS, HIDDEN_DIM, HIDDEN_DIM), HIDDEN_DIM, HIDDEN_DIM),
        # GCN encoder weights
        "gcn_w1": _xavier(ks[2], (INP_DIM, HIDDEN_DIM), INP_DIM, HIDDEN_DIM),
        "gcn_w2": _xavier(ks[3], (HIDDEN_DIM, HIDDEN_DIM), HIDDEN_DIM, HIDDEN_DIM),
        # fc1: hidden -> inp_dim ; fc2: inp_dim -> ClassNum (bias kept 2-D (1, out))
        "fc1_w": _xavier(ks[4], (HIDDEN_DIM, INP_DIM), HIDDEN_DIM, INP_DIM),
        "fc1_b": _xavier(ks[5], (1, INP_DIM), HIDDEN_DIM, INP_DIM),
        "fc2_w": _xavier(ks[6], (INP_DIM, NUM_CLASSES), INP_DIM, NUM_CLASSES),
        "fc2_b": _xavier(ks[7], (1, NUM_CLASSES), INP_DIM, NUM_CLASSES),
    }


if __name__ == "__main__":
    key = jax.random.PRNGKey(0)
    k_feat, k_par = jax.random.split(key)
    features = jax.random.normal(k_feat, (NUM_NODES, INP_DIM), jnp.float32)
    params = make_params(k_par)

    pred = jax.jit(fpsimnet_forward)(features, params)
    pred = jax.block_until_ready(pred)

    ref = fpsimnet_reference(features, params)
    assert pred.shape == (NUM_NODES, NUM_CLASSES)
    assert jnp.allclose(pred, ref, rtol=1e-2, atol=1e-2), "mismatch vs reference"

    # TODO(synk): topk / epsilon neighbourhood pruning and ctx_mask paths of
    # GraphLearner are None in this config and are not implemented here.
    print("KERNEL_OK")
</pallas_src>

<mosaic_0001>
module attributes {stable_mosaic.version = 11 : i64} {
  func.func @_fpsimnet_kernel(%arg0: memref<16x32xf32, #tpu.memory_space<vmem>>, %arg1: memref<32x128xf32, #tpu.memory_space<vmem>>, %arg2: memref<32x128xf32, #tpu.memory_space<vmem>>, %arg3: memref<32x32xf32, #tpu.memory_space<vmem>>, %arg4: memref<32x32xf32, #tpu.memory_space<vmem>>, %arg5: memref<32x32xf32, #tpu.memory_space<vmem>>, %arg6: memref<1x32xf32, #tpu.memory_space<vmem>>, %arg7: memref<32x128xf32, #tpu.memory_space<vmem>>, %arg8: memref<1x128xf32, #tpu.memory_space<vmem>>, %arg9: memref<16x128xf32, #tpu.memory_space<vmem>>) attributes {dimension_semantics = [], scalar_prefetch = 0 : i64, scratch_operands = 0 : i64, tpu.core_type = #tpu.core_type<tc>} {
    %c0 = arith.constant 0 : index
    %c0_0 = arith.constant 0 : index
    %0 = vector.load %arg0[%c0, %c0_0] : memref<16x32xf32, #tpu.memory_space<vmem>>, vector<16x32xf32>
    %1 = tpu.iota {dimensions = array<i32: 0>} : vector<16x16xi32>
    %2 = tpu.iota {dimensions = array<i32: 1>} : vector<16x16xi32>
    %3 = arith.cmpi eq, %1, %2 : vector<16x16xi32>
    %cst = arith.constant 1.000000e+00 : f32
    %cst_1 = arith.constant 0.000000e+00 : f32
    %4 = vector.broadcast %cst : f32 to vector<16x16xf32>
    %5 = vector.broadcast %cst_1 : f32 to vector<16x16xf32>
    %6 = arith.select %3, %4, %5 : vector<16x16xi1>, vector<16x16xf32>
    %c0_2 = arith.constant 0 : index
    %c0_3 = arith.constant 0 : index
    %7 = vector.load %arg1[%c0_2, %c0_3] : memref<32x128xf32, #tpu.memory_space<vmem>>, vector<32x128xf32>
    %cst_4 = arith.constant dense<0.000000e+00> : vector<16x128xf32>
    %8 = tpu.matmul %0, %7, %cst_4 {dimension_numbers = #tpu.dot_dimension_numbers<[1], [0], [0], [1], [0, 0, 1, 1], [], []>} : vector<16x32xf32>, vector<32x128xf32>, vector<16x128xf32> -> vector<16x128xf32>
    %cst_5 = arith.constant 0.000000e+00 : f32
    %9 = vector.broadcast %cst_5 : f32 to vector<16x128xf32>
    %10 = arith.maximumf %8, %9 : vector<16x128xf32>
    %cst_6 = arith.constant dense<0.000000e+00> : vector<16x16xf32>
    %11 = tpu.matmul %10, %10, %cst_6 {dimension_numbers = #tpu.dot_dimension_numbers<[1], [1], [0], [0], [0, 0, 1, 0], [], []>} : vector<16x128xf32>, vector<16x128xf32>, vector<16x16xf32> -> vector<16x16xf32>
    %cst_7 = arith.constant 2.500000e-01 : f32
    %12 = vector.broadcast %cst_7 : f32 to vector<16x16xf32>
    %13 = arith.mulf %11, %12 : vector<16x16xf32>
    %cst_8 = arith.constant dense<0xFF800000> : vector<16xf32>
    %14 = vector.multi_reduction <maximumf>, %13, %cst_8 [1] : vector<16x16xf32> to vector<16xf32>
    %15 = vector.shape_cast %14 : vector<16xf32> to vector<16x1xf32>
    %16 = vector.broadcast %15 : vector<16x1xf32> to vector<16x16xf32>
    %17 = arith.subf %13, %16 : vector<16x16xf32>
    %18 = math.exp %17 : vector<16x16xf32>
    %cst_9 = arith.constant dense<0.000000e+00> : vector<16xf32>
    %19 = vector.multi_reduction <add>, %18, %cst_9 [1] : vector<16x16xf32> to vector<16xf32>
    %20 = vector.shape_cast %19 : vector<16xf32> to vector<16x1xf32>
    %21 = vector.broadcast %20 : vector<16x1xf32> to vector<16x16xf32>
    %22 = arith.divf %18, %21 : vector<16x16xf32>
    %23 = arith.addf %22, %6 : vector<16x16xf32>
    %c0_10 = arith.constant 0 : index
    %c0_11 = arith.constant 0 : index
    %24 = vector.load %arg3[%c0_10, %c0_11] : memref<32x32xf32, #tpu.memory_space<vmem>>, vector<32x32xf32>
    %cst_12 = arith.constant dense<0.000000e+00> : vector<16x32xf32>
    %25 = tpu.matmul %0, %24, %cst_12 {dimension_numbers = #tpu.dot_dimension_numbers<[1], [0], [0], [1], [0, 0, 1, 1], [], []>} : vector<16x32xf32>, vector<32x32xf32>, vector<16x32xf32> -> vector<16x32xf32>
    %cst_13 = arith.constant dense<0.000000e+00> : vector<16x32xf32>
    %26 = tpu.matmul %23, %25, %cst_13 {dimension_numbers = #tpu.dot_dimension_numbers<[1], [0], [0], [1], [0, 0, 1, 1], [], []>} : vector<16x16xf32>, vector<16x32xf32>, vector<16x32xf32> -> vector<16x32xf32>
    %cst_14 = arith.constant 0.000000e+00 : f32
    %27 = vector.broadcast %cst_14 : f32 to vector<16x32xf32>
    %28 = arith.maximumf %26, %27 : vector<16x32xf32>
    %c0_15 = arith.constant 0 : index
    %c0_16 = arith.constant 0 : index
    %29 = vector.load %arg4[%c0_15, %c0_16] : memref<32x32xf32, #tpu.memory_space<vmem>>, vector<32x32xf32>
    %cst_17 = arith.constant dense<0.000000e+00> : vector<16x32xf32>
    %30 = tpu.matmul %28, %29, %cst_17 {dimension_numbers = #tpu.dot_dimension_numbers<[1], [0], [0], [1], [0, 0, 1, 1], [], []>} : vector<16x32xf32>, vector<32x32xf32>, vector<16x32xf32> -> vector<16x32xf32>
    %cst_18 = arith.constant dense<0.000000e+00> : vector<16x32xf32>
    %31 = tpu.matmul %23, %30, %cst_18 {dimension_numbers = #tpu.dot_dimension_numbers<[1], [0], [0], [1], [0, 0, 1, 1], [], []>} : vector<16x16xf32>, vector<16x32xf32>, vector<16x32xf32> -> vector<16x32xf32>
    %c0_19 = arith.constant 0 : index
    %c0_20 = arith.constant 0 : index
    %32 = vector.load %arg2[%c0_19, %c0_20] : memref<32x128xf32, #tpu.memory_space<vmem>>, vector<32x128xf32>
    %cst_21 = arith.constant dense<0.000000e+00> : vector<16x128xf32>
    %33 = tpu.matmul %31, %32, %cst_21 {dimension_numbers = #tpu.dot_dimension_numbers<[1], [0], [0], [1], [0, 0, 1, 1], [], []>} : vector<16x32xf32>, vector<32x128xf32>, vector<16x128xf32> -> vector<16x128xf32>
    %cst_22 = arith.constant 0.000000e+00 : f32
    %34 = vector.broadcast %cst_22 : f32 to vector<16x128xf32>
    %35 = arith.maximumf %33, %34 : vector<16x128xf32>
    %cst_23 = arith.constant dense<0.000000e+00> : vector<16x16xf32>
    %36 = tpu.matmul %35, %35, %cst_23 {dimension_numbers = #tpu.dot_dimension_numbers<[1], [1], [0], [0], [0, 0, 1, 0], [], []>} : vector<16x128xf32>, vector<16x128xf32>, vector<16x16xf32> -> vector<16x16xf32>
    %cst_24 = arith.constant 2.500000e-01 : f32
    %37 = vector.broadcast %cst_24 : f32 to vector<16x16xf32>
    %38 = arith.mulf %36, %37 : vector<16x16xf32>
    %cst_25 = arith.constant dense<0xFF800000> : vector<16xf32>
    %39 = vector.multi_reduction <maximumf>, %38, %cst_25 [1] : vector<16x16xf32> to vector<16xf32>
    %40 = vector.shape_cast %39 : vector<16xf32> to vector<16x1xf32>
    %41 = vector.broadcast %40 : vector<16x1xf32> to vector<16x16xf32>
    %42 = arith.subf %38, %41 : vector<16x16xf32>
    %43 = math.exp %42 : vector<16x16xf32>
    %cst_26 = arith.constant dense<0.000000e+00> : vector<16xf32>
    %44 = vector.multi_reduction <add>, %43, %cst_26 [1] : vector<16x16xf32> to vector<16xf32>
    %45 = vector.shape_cast %44 : vector<16xf32> to vector<16x1xf32>
    %46 = vector.broadcast %45 : vector<16x1xf32> to vector<16x16xf32>
    %47 = arith.divf %43, %46 : vector<16x16xf32>
    %48 = arith.addf %47, %6 : vector<16x16xf32>
    %cst_27 = arith.constant 5.000000e-01 : f32
    %49 = vector.broadcast %cst_27 : f32 to vector<16x16xf32>
    %50 = arith.mulf %49, %48 : vector<16x16xf32>
    %cst_28 = arith.constant 5.000000e-01 : f32
    %51 = vector.broadcast %cst_28 : f32 to vector<16x16xf32>
    %52 = arith.mulf %51, %23 : vector<16x16xf32>
    %53 = arith.addf %50, %52 : vector<16x16xf32>
    %c0_29 = arith.constant 0 : index
    %c0_30 = arith.constant 0 : index
    %54 = vector.load %arg3[%c0_29, %c0_30] : memref<32x32xf32, #tpu.memory_space<vmem>>, vector<32x32xf32>
    %cst_31 = arith.constant dense<0.000000e+00> : vector<16x32xf32>
    %55 = tpu.matmul %0, %54, %cst_31 {dimension_numbers = #tpu.dot_dimension_numbers<[1], [0], [0], [1], [0, 0, 1, 1], [], []>} : vector<16x32xf32>, vector<32x32xf32>, vector<16x32xf32> -> vector<16x32xf32>
    %cst_32 = arith.constant dense<0.000000e+00> : vector<16x32xf32>
    %56 = tpu.matmul %53, %55, %cst_32 {dimension_numbers = #tpu.dot_dimension_numbers<[1], [0], [0], [1], [0, 0, 1, 1], [], []>} : vector<16x16xf32>, vector<16x32xf32>, vector<16x32xf32> -> vector<16x32xf32>
    %cst_33 = arith.constant 0.000000e+00 : f32
    %57 = vector.broadcast %cst_33 : f32 to vector<16x32xf32>
    %58 = arith.maximumf %56, %57 : vector<16x32xf32>
    %c0_34 = arith.constant 0 : index
    %c0_35 = arith.constant 0 : index
    %59 = vector.load %arg4[%c0_34, %c0_35] : memref<32x32xf32, #tpu.memory_space<vmem>>, vector<32x32xf32>
    %cst_36 = arith.constant dense<0.000000e+00> : vector<16x32xf32>
    %60 = tpu.matmul %58, %59, %cst_36 {dimension_numbers = #tpu.dot_dimension_numbers<[1], [0], [0], [1], [0, 0, 1, 1], [], []>} : vector<16x32xf32>, vector<32x32xf32>, vector<16x32xf32> -> vector<16x32xf32>
    %cst_37 = arith.constant dense<0.000000e+00> : vector<16x32xf32>
    %61 = tpu.matmul %53, %60, %cst_37 {dimension_numbers = #tpu.dot_dimension_numbers<[1], [0], [0], [1], [0, 0, 1, 1], [], []>} : vector<16x16xf32>, vector<16x32xf32>, vector<16x32xf32> -> vector<16x32xf32>
    %c0_38 = arith.constant 0 : index
    %c0_39 = arith.constant 0 : index
    %62 = vector.load %arg5[%c0_38, %c0_39] : memref<32x32xf32, #tpu.memory_space<vmem>>, vector<32x32xf32>
    %cst_40 = arith.constant dense<0.000000e+00> : vector<16x32xf32>
    %63 = tpu.matmul %61, %62, %cst_40 {dimension_numbers = #tpu.dot_dimension_numbers<[1], [0], [0], [1], [0, 0, 1, 1], [], []>} : vector<16x32xf32>, vector<32x32xf32>, vector<16x32xf32> -> vector<16x32xf32>
    %c0_41 = arith.constant 0 : index
    %c0_42 = arith.constant 0 : index
    %64 = vector.load %arg6[%c0_41, %c0_42] : memref<1x32xf32, #tpu.memory_space<vmem>>, vector<1x32xf32>
    %65 = vector.broadcast %64 : vector<1x32xf32> to vector<16x32xf32>
    %66 = arith.addf %63, %65 : vector<16x32xf32>
    %cst_43 = arith.constant 5.000000e-01 : f32
    %67 = vector.broadcast %cst_43 : f32 to vector<16x32xf32>
    %68 = arith.mulf %67, %0 : vector<16x32xf32>
    %69 = arith.addf %68, %66 : vector<16x32xf32>
    %c0_44 = arith.constant 0 : index
    %c0_45 = arith.constant 0 : index
    %70 = vector.load %arg7[%c0_44, %c0_45] : memref<32x128xf32, #tpu.memory_space<vmem>>, vector<32x128xf32>
    %cst_46 = arith.constant dense<0.000000e+00> : vector<16x128xf32>
    %71 = tpu.matmul %69, %70, %cst_46 {dimension_numbers = #tpu.dot_dimension_numbers<[1], [0], [0], [1], [0, 0, 1, 1], [], []>} : vector<16x32xf32>, vector<32x128xf32>, vector<16x128xf32> -> vector<16x128xf32>
    %c0_47 = arith.constant 0 : index
    %c0_48 = arith.constant 0 : index
    %72 = vector.load %arg8[%c0_47, %c0_48] : memref<1x128xf32, #tpu.memory_space<vmem>>, vector<1x128xf32>
    %73 = vector.broadcast %72 : vector<1x128xf32> to vector<16x128xf32>
    %74 = arith.addf %71, %73 : vector<16x128xf32>
    %c0_49 = arith.constant 0 : index
    %c0_50 = arith.constant 0 : index
    %75 = vector.load %arg9[%c0_49, %c0_50] : memref<16x128xf32, #tpu.memory_space<vmem>>, vector<16x128xf32>
    tpu.vector_store %arg9[%c0_49, %c0_50], %74 {strides = array<i32>} : memref<16x128xf32, #tpu.memory_space<vmem>>, vector<16x128xf32>,
    return
  }
}

</mosaic_0001>

<bundles_post_ra>
// kernel: fpsimnet_forward.1
= control target key start
LH: loop header
LB: loop body
LE: loop exit
PB: predicated region body
PF: predicated region fallthrough
CT: control target
= control target key end

     0   :  { %vm47_vm0 = vcmask 261120   ;;  %vm208_vm1 = vcmask 130048   ;;  %v34_v42 = vlaneseq  ;;  %v1488_v48 = vmov 0.0   ;;  %s1699_s1 = inlined_call_operand.vmem [shape: f32[32,128], index: 1, kind: input, shape index: {}]   ;;  %s1700_s0 = inlined_call_operand.vmem [shape: f32[16,32], index: 0, kind: input, shape index: {}]   ;;  %s1701_s3 = inlined_call_operand.vmem [shape: f32[32,32], index: 3, kind: input, shape index: {}]   ;;  %s1702_s4 = inlined_call_operand.vmem [shape: f32[32,32], index: 4, kind: input, shape index: {}]   ;;  %s1703_s2 = inlined_call_operand.vmem [shape: f32[32,128], index: 2, kind: input, shape index: {}]   ;;  %s1704_s5 = inlined_call_operand.vmem [shape: f32[32,32], index: 5, kind: input, shape index: {}]   ;;  %s1705_s7 = inlined_call_operand.vmem [shape: f32[32,128], index: 7, kind: input, shape index: {}]   ;;  %s1706_s6 = inlined_call_operand.vmem [shape: f32[1,32], index: 6, kind: input, shape index: {}]   ;;  %s1707_s8 = inlined_call_operand.vmem [shape: f32[1,128], index: 8, kind: input, shape index: {}]   ;;  %s1708_s9 = inlined_call_operand.vmem [shape: f32[16,128], index: 9, kind: output, shape index: {}]  }
   0x1   :  { %v43_v0 = vld [vmem:[%s1699_s1] sm:$0xff]  ;;  %v44_v1 = vld [vmem:[%s1699_s1 + $0x8] sm:$0xff]  ;;  %v45_v2 = vld [vmem:[%s1699_s1 + $0x10] sm:$0xff] }
   0x2   :  { %v1391_v3 = vpack.c.bf16 %v44_v1, %v43_v0  ;;  %v46_v4 = vld [vmem:[%s1699_s1 + $0x18] sm:$0xff]  ;;  %v1554_v5 = vld [vmem:[%s1700_s0] sm:$0xff]  ;;  %v1561_v7 = vld [vmem:[%s1700_s0 + $0x8] sm:$0xff]  ;;  %v35_v44 = vshrl.u32 %v34_v42, 7  ;;  %v38_v45 = vand.u32 127, %v34_v42 }
   0x3   :  { %v1395_v6 = vpack.c.bf16 %v46_v4, %v45_v2  ;;  %1280 = vmatprep.mubr.msk.f32.mxu0 %vm47_vm0, %v1554_v5  ;;  %v233_v13 = vld [vmem:[%s1701_s3] sm:$0xff]  ;;  %v234_v14 = vld [vmem:[%s1701_s3 + $0x8] sm:$0xff]  ;;  %v235_v15 = vld [vmem:[%s1701_s3 + $0x10] sm:$0xff] }
   0x4   :  { %1392 = vmatprep.subr.bf16.mxu0 %v1391_v3  ;;  %v1403_v16 = vpack.c.bf16 %v234_v14, %v233_v13  ;;  %v236_v17 = vld [vmem:[%s1701_s3 + $0x18] sm:$0xff]  ;;  %v395_v38 = vld [vmem:[%s1702_s4] sm:$0xff]  ;;  %v396_v39 = vld [vmem:[%s1702_s4 + $0x8] sm:$0xff]  ;;  %v36_v46 = vadd.s32 8, %v35_v44  ;;  %vm39_vm2 = vcmp.eq.s32.totalorder %v35_v44, %v38_v45 }
   0x5   :  { %1394 = vmatpush3.bf16.msra.mxu0 %v1391_v3  ;;  %v1407_v18 = vpack.c.bf16 %v236_v17, %v235_v15  ;;  %v1595_v40 = vpack.c.bf16 %v396_v39, %v395_v38  ;;  %v1598_v49 = vsel %vm39_vm2, 1.0, %v1488_v48  ;;  %v397_v56 = vld [vmem:[%s1702_s4 + $0x10] sm:$0xff]  ;;  %v398_v57 = vld [vmem:[%s1702_s4 + $0x18] sm:$0xff]  ;;  %v555_v63 = vld [vmem:[%s1703_s2] sm:$0xff] }
   0x6   :  { %1396 = vmatprep.subr.bf16.mxu0 %v1395_v6  ;;  %vm40_vm3 = vcmp.eq.s32.totalorder %v36_v46, %v38_v45  ;;  %v1419_v58 = vpack.c.bf16 %v398_v57, %v397_v56  ;;  %v556_v0 = vld [vmem:[%s1703_s2 + $0x8] sm:$0xff]  ;;  %v990_v57 = vld [vmem:[%s1704_s5 + $0x10] sm:$0xff] }
   0x7   :  { %v1603_v53 = vsel %vm40_vm3, 1.0, %v1488_v48  ;;  %v1427_v4 = vpack.c.bf16 %v556_v0, %v555_v63 }
   0x9   :  { %1398 = vmatpush3.bf16.msra.mxu0 %v1395_v6  ;;  %v557_v6 = vld [vmem:[%s1703_s2 + $0x10] sm:$0xff] }
   0xa   :  { %1404 = vmatprep.subr.bf16.mxu0 %v1403_v16 }
   0xc   :  { %1281 = vmatmul.mubr.msk.f32.vlgmr.msra.gmra.mrb[0].mxu0 %vm47_vm0, %v1561_v7 }
   0xd   :  { %1298 = vmatprep.mubr.msk.f32.mxu0 %vm47_vm0, %v1554_v5  ;;  %1406 = vmatpush3.bf16.msra.mxu0 %v1403_v16 }
   0xe   :  { %1408 = vmatprep.subr.bf16.mxu0 %v1407_v18 }
  0x11   :  { %1410 = vmatpush3.bf16.msra.mxu0 %v1407_v18 }
  0x14   :  { %1299 = vmatmul.mubr.msk.f32.vlgmr.msra.gmra.mrb[2].mxu0 %vm47_vm0, %v1561_v7 }
  0xdf   :  { %v1282_v8 = vpop.f32.mrb[0].mxu0 }
  0xe0   :  { %v130_v9 = vmax.f32 %v1282_v8, 0.0  ;;  %v120_v10 = vpop.f32.mrb[1].mxu0  ;;  %v558_v8 = vld [vmem:[%s1703_s2 + $0x18] sm:$0xff] }
  0xe1   :  { %v129_v11 = vmax.f32 %v120_v10, 0.0 }
  0xe3   :  { %1287 = vmatprep.mubr.f32.mxu1 %v129_v11  ;;  %v1399_v12 = vpack.c.bf16 %v130_v9, %v129_v11 }
  0xe5   :  { %1400 = vmatprep.subr.bf16.mxu1 %v1399_v12 }
  0xe6   :  { %1402 = vmatpush3.bf16.xpose.msra.mxu1 %v1399_v12 }
  0xe7   :  { %v1300_v35 = vpop.f32.mrb[2].mxu0 }
  0xe8   :  { %v303_v36 = vpop.f32.mrb[3].mxu0 }
  0xe9   :  { %v1585_v37 = vpack.c.bf16 %v1300_v35, %v303_v36 }
  0xeb   :  { %1412 = vmatprep.subr.bf16.mxu1 %v1585_v37 }
  0xed   :  { %1288 = vmatmul.mubr.f32.vlgmr.msra.gmra.mrb[0].mxu1 %v130_v9  ;;  %v1431_v9 = vpack.c.bf16 %v558_v8, %v557_v6  ;;  %v1080_v6 = vmul.f32 0.5, %v1554_v5 }
  0xee   :  { %1414 = vmatpush3.bf16.msra.mxu1 %v1585_v37 }
  0xef   :  { %1416 = vmatprep.subr.bf16.mxu1 %v1595_v40 }
 0x1c0   :  { %v1289_v19 = vpop.f32.mrb[0].mxu1 }
 0x1c1   :  { %v197_v20 = vpop.f32.mrb[1].mxu1  ;;  %v207_v22 = vmul.f32 0.25, %v1289_v19 }
 0x1c2   :  { %v206_v21 = vmul.f32 0.25, %v197_v20 }
 0x1c3   :  { %v212_v24 = vsel %vm208_vm1, %v207_v22, -inf }
 0x1c4   :  { %v209_v23 = vsel %vm208_vm1, %v206_v21, -inf }
 0x1c5   :  { %210 = vmax.xlane.f32.xlu0 %v209_v23 }
 0x1c9   :  { %213 = vmax.xlane.f32.xlu0 %v212_v24 }
 0x252   :  { %v211_v25 = vpop.xlane.xlu0 %210 }
 0x253   :  { %v215_v26 = vsub.f32 %v206_v21, %v211_v25 }
 0x255   :  { %v217_v27 = vmul.f32 1.442695, %v215_v26 }
 0x256   :  { %v214_v28 = vpop.xlane.xlu0 %213 }
 0x257   :  { %1472 = vpow2.f32 %v217_v27  ;;  %v216_v29 = vsub.f32 %v207_v22, %v214_v28 }
 0x259   :  { %v219_v30 = vmul.f32 1.442695, %v216_v29 }
 0x25b   :  { %1474 = vpow2.f32 %v219_v30 }
 0x261   :  { %v1473_v31 = vpop.eup %1472 }
 0x262   :  { %v221_v32 = vsel %vm208_vm1, %v1473_v31, 0.0 }
 0x263   :  { %222 = vadd.xlane.f32.xlu1 %v221_v32 }
 0x265   :  { %v1475_v33 = vpop.eup %1474 }
 0x266   :  { %v224_v34 = vsel %vm208_vm1, %v1475_v33, 0.0 }
 0x267   :  { %225 = vadd.xlane.f32.xlu1 %v224_v34 }
 0x2f0   :  { %v223_v41 = vpop.xlane.xlu1 %222 }
 0x2f1   :  { %1476 = vrcp.f32 %v223_v41 }
 0x2f4   :  { %v226_v43 = vpop.xlane.xlu1 %225 }
 0x2f5   :  { %1478 = vrcp.f32 %v226_v43 }
 0x2fb   :  { %v1477_v47 = vpop.eup %1476 }
 0x2fc   :  { %v228_v50 = vmul.f32 %v1477_v47, %v1473_v31 }
 0x2fe   :  { %v1601_v51 = vadd.f32 %v228_v50, %v1598_v49 }
 0x2ff   :  { %v1479_v52 = vpop.eup %1478 }
 0x300   :  { %v230_v54 = vmul.f32 %v1479_v52, %v1475_v33  ;;  %1305 = vmatprep.mubr.msk.f32.mxu1 %vm208_vm1, %v1601_v51  ;;  %1323 = vmatprep.mubr.msk.f32.mxu0 %vm208_vm1, %v1601_v51  ;;  %v745_v43 = vmul.f32 0.5, %v1601_v51  ;;  %v989_v51 = vld [vmem:[%s1704_s5 + $0x8] sm:$0xff] }
 0x302   :  { %v1610_v55 = vadd.f32 %v230_v54, %v1603_v53 }
 0x304   :  { %1306 = vmatmul.mubr.msk.f32.vlgmr.msra.gmra.mrb[2].mxu1 %vm208_vm1, %v1610_v55  ;;  %v746_v44 = vmul.f32 0.5, %v1610_v55 }
 0x305   :  { %1418 = vmatpush3.bf16.msra.mxu1 %v1595_v40 }
 0x306   :  { %1420 = vmatprep.subr.bf16.mxu1 %v1419_v58 }
 0x309   :  { %1422 = vmatpush3.bf16.msra.mxu1 %v1419_v58 }
 0x3d7   :  { %v1307_v59 = vpop.f32.mrb[2].mxu1 }
 0x3d8   :  { %v384_v60 = vpop.f32.mrb[3].mxu1  ;;  %v394_v62 = vmax.f32 %v1307_v59, 0.0 }
 0x3d9   :  { %v393_v61 = vmax.f32 %v384_v60, 0.0  ;;  %v1084_v60 = vld [vmem:[%s1705_s7] sm:$0xff] }
 0x3db   :  { %1316 = vmatprep.mubr.msk.f32.mxu1 %vm47_vm0, %v393_v61  ;;  %v1085_v61 = vld [vmem:[%s1705_s7 + $0x8] sm:$0xff] }
 0x3dc   :  { %1317 = vmatmul.mubr.msk.f32.vlgmr.msra.gmra.mrb[4].mxu1 %vm47_vm0, %v394_v62  ;;  %v1463_v62 = vpack.c.bf16 %v1085_v61, %v1084_v60 }
 0x4af   :  { %v1318_v1 = vpop.f32.mrb[4].mxu1 }
 0x4b0   :  { %v471_v2 = vpop.f32.mrb[5].mxu1 }
 0x4b1   :  { %v1423_v3 = vpack.c.bf16 %v1318_v1, %v471_v2  ;;  %v1086_v1 = vld [vmem:[%s1705_s7 + $0x10] sm:$0xff]  ;;  %v1087_v2 = vld [vmem:[%s1705_s7 + $0x18] sm:$0xff] }
 0x4b3   :  { %1424 = vmatprep.subr.bf16.mxu0 %v1423_v3 }
 0x4b4   :  { %1426 = vmatpush3.bf16.msra.mxu0 %v1423_v3  ;;  %v1467_v3 = vpack.c.bf16 %v1087_v2, %v1086_v1 }
 0x4b5   :  { %1428 = vmatprep.subr.bf16.mxu0 %v1427_v4 }
 0x4b7   :  { %1324 = vmatmul.mubr.msk.f32.vlgmr.msra.gmra.mrb[4].mxu0 %vm208_vm1, %v1610_v55 }
 0x4b8   :  { %1430 = vmatpush3.bf16.msra.mxu0 %v1427_v4  ;;  %v1200_v4 = vld [vmem:[%s1706_s6] ss:$0 sm:$0xff] }
 0x4b9   :  { %1432 = vmatprep.subr.bf16.mxu0 %v1431_v9 }
 0x4bc   :  { %1434 = vmatpush3.bf16.msra.mxu0 %v1431_v9 }
 0x4bd   :  { %1440 = vmatprep.subr.bf16.mxu0 %v1585_v37 }
 0x58a   :  { %v1325_v10 = vpop.f32.mrb[4].mxu0 }
 0x58b   :  { %v546_v11 = vpop.f32.mrb[5].mxu0 }
 0x58c   :  { %1334 = vmatprep.mubr.msk.f32.mxu0 %vm47_vm0, %v546_v11 }
 0x58d   :  { %1335 = vmatmul.mubr.msk.f32.vlgmr.msra.gmra.mrb[6].mxu0 %vm47_vm0, %v1325_v10  ;;  %v1081_v10 = vmul.f32 0.5, %v1561_v7 }
 0x58e   :  { %1442 = vmatpush3.bf16.msra.mxu0 %v1585_v37 }
 0x660   :  { %v1336_v12 = vpop.f32.mrb[6].mxu0 }
 0x661   :  { %v641_v13 = vmax.f32 %v1336_v12, 0.0  ;;  %v631_v14 = vpop.f32.mrb[7].mxu0 }
 0x662   :  { %v640_v15 = vmax.f32 %v631_v14, 0.0 }
 0x664   :  { %v1435_v16 = vpack.c.bf16 %v641_v13, %v640_v15  ;;  %1341 = vmatprep.mubr.f32.mxu1 %v640_v15  ;;  %v1203_v15 = vld [vmem:[%s1707_s8] ss:$0 sm:$0xff] }
 0x666   :  { %1436 = vmatprep.subr.bf16.mxu1 %v1435_v16 }
 0x667   :  { %1438 = vmatpush3.bf16.xpose.msra.mxu1 %v1435_v16 }
 0x668   :  { %1444 = vmatprep.subr.bf16.mxu1 %v1595_v40 }
 0x66e   :  { %1342 = vmatmul.mubr.f32.vlgmr.msra.gmra.mrb[6].mxu1 %v641_v13 }
 0x66f   :  { %1446 = vmatpush3.bf16.msra.mxu1 %v1595_v40 }
 0x670   :  { %1448 = vmatprep.subr.bf16.mxu1 %v1419_v58 }
 0x673   :  { %1450 = vmatpush3.bf16.msra.mxu1 %v1419_v58  ;;  %v991_v58 = vld [vmem:[%s1704_s5 + $0x18] sm:$0xff] }
 0x674   :  { %v1459_v59 = vpack.c.bf16 %v991_v58, %v990_v57  ;;  %1464 = vmatprep.subr.bf16.mxu1 %v1463_v62 }
 0x741   :  { %v1343_v17 = vpop.f32.mrb[6].mxu1 }
 0x742   :  { %v718_v18 = vmul.f32 0.25, %v1343_v17  ;;  %v708_v19 = vpop.f32.mrb[7].mxu1 }
 0x743   :  { %v717_v20 = vmul.f32 0.25, %v708_v19 }
 0x744   :  { %v722_v21 = vsel %vm208_vm1, %v718_v18, -inf }
 0x745   :  { %723 = vmax.xlane.f32.xlu1 %v722_v21  ;;  %v719_v22 = vsel %vm208_vm1, %v717_v20, -inf }
 0x746   :  { %720 = vmax.xlane.f32.xlu0 %v719_v22 }
 0x7d2   :  { %v724_v23 = vpop.xlane.xlu1 %723 }
 0x7d3   :  { %v726_v24 = vsub.f32 %v718_v18, %v724_v23  ;;  %v721_v25 = vpop.xlane.xlu0 %720 }
 0x7d4   :  { %v725_v26 = vsub.f32 %v717_v20, %v721_v25 }
 0x7d5   :  { %v729_v27 = vmul.f32 1.442695, %v726_v24 }
 0x7d6   :  { %v727_v28 = vmul.f32 1.442695, %v725_v26 }
 0x7d7   :  { %1480 = vpow2.f32 %v729_v27 }
 0x7d8   :  { %1482 = vpow2.f32 %v727_v28 }
 0x7e1   :  { %v1481_v29 = vpop.eup %1480 }
 0x7e2   :  { %v1483_v30 = vpop.eup %1482  ;;  %v734_v31 = vsel %vm208_vm1, %v1481_v29, 0.0 }
 0x7e3   :  { %735 = vadd.xlane.f32.xlu1 %v734_v31  ;;  %v731_v32 = vsel %vm208_vm1, %v1483_v30, 0.0 }
 0x7e4   :  { %732 = vadd.xlane.f32.xlu0 %v731_v32 }
 0x870   :  { %v736_v33 = vpop.xlane.xlu1 %735 }
 0x871   :  { %1484 = vrcp.f32 %v736_v33  ;;  %v733_v34 = vpop.xlane.xlu0 %732 }
 0x872   :  { %1486 = vrcp.f32 %v733_v34 }
 0x87b   :  { %v1485_v35 = vpop.eup %1484 }
 0x87c   :  { %v1487_v36 = vpop.eup %1486  ;;  %v740_v37 = vmul.f32 %v1485_v35, %v1481_v29 }
 0x87d   :  { %v738_v38 = vmul.f32 %v1487_v36, %v1483_v30 }
 0x87e   :  { %v742_v39 = vadd.f32 %v740_v37, %v1603_v53 }
 0x87f   :  { %v741_v40 = vadd.f32 %v738_v38, %v1598_v49  ;;  %v988_v49 = vld [vmem:[%s1704_s5] sm:$0xff] }
 0x880   :  { %v744_v41 = vmul.f32 0.5, %v742_v39  ;;  %v1455_v56 = vpack.c.bf16 %v989_v51, %v988_v49 }
 0x881   :  { %v743_v42 = vmul.f32 0.5, %v741_v40 }
 0x882   :  { %v748_v46 = vadd.f32 %v746_v44, %v744_v41 }
 0x883   :  { %v747_v45 = vadd.f32 %v745_v43, %v743_v42 }
 0x885   :  { %1348 = vmatprep.mubr.msk.f32.mxu0 %vm208_vm1, %v747_v45 }
 0x886   :  { %1349 = vmatmul.mubr.msk.f32.vlgmr.msra.gmra.mrb[8].mxu0 %vm208_vm1, %v748_v46 }
 0x887   :  { %1366 = vmatprep.mubr.msk.f32.mxu0 %vm208_vm1, %v747_v45 }
 0x959   :  { %v1350_v47 = vpop.f32.mrb[8].mxu0 }
 0x95a   :  { %v821_v48 = vpop.f32.mrb[9].mxu0  ;;  %v831_v52 = vmax.f32 %v1350_v47, 0.0 }
 0x95b   :  { %v830_v50 = vmax.f32 %v821_v48, 0.0 }
 0x95d   :  { %1359 = vmatprep.mubr.msk.f32.mxu1 %vm47_vm0, %v830_v50 }
 0x95e   :  { %1360 = vmatmul.mubr.msk.f32.vlgmr.msra.gmra.mrb[8].mxu1 %vm47_vm0, %v831_v52 }
 0x95f   :  { %1466 = vmatpush3.bf16.msra.mxu1 %v1463_v62 }
 0x960   :  { %1468 = vmatprep.subr.bf16.mxu1 %v1467_v3 }
 0x963   :  { %1470 = vmatpush3.bf16.msra.mxu1 %v1467_v3 }
 0xa31   :  { %v1361_v53 = vpop.f32.mrb[8].mxu1 }
 0xa32   :  { %v904_v54 = vpop.f32.mrb[9].mxu1 }
 0xa33   :  { %v1451_v55 = vpack.c.bf16 %v1361_v53, %v904_v54 }
 0xa35   :  { %1452 = vmatprep.subr.bf16.mxu0 %v1451_v55 }
 0xa36   :  { %1454 = vmatpush3.bf16.msra.mxu0 %v1451_v55 }
 0xa37   :  { %1456 = vmatprep.subr.bf16.mxu0 %v1455_v56 }
 0xa39   :  { %1367 = vmatmul.mubr.msk.f32.vlgmr.msra.gmra.mrb[10].mxu0 %vm208_vm1, %v748_v46 }
 0xa3a   :  { %1458 = vmatpush3.bf16.msra.mxu0 %v1455_v56 }
 0xa3b   :  { %1460 = vmatprep.subr.bf16.mxu0 %v1459_v59 }
 0xa3e   :  { %1462 = vmatpush3.bf16.msra.mxu0 %v1459_v59 }
 0xb0c   :  { %v1368_v63 = vpop.f32.mrb[10].mxu0 }
 0xb0d   :  { %v979_v0 = vpop.f32.mrb[11].mxu0 }
 0xb0e   :  { %1377 = vmatprep.mubr.msk.f32.mxu0 %vm47_vm0, %v979_v0 }
 0xb0f   :  { %1378 = vmatmul.mubr.msk.f32.vlgmr.msra.gmra.mrb[12].mxu0 %vm47_vm0, %v1368_v63 }
 0xbe2   :  { %v1379_v8 = vpop.f32.mrb[12].mxu0 }
 0xbe3   :  { %v1077_v9 = vadd.f32 %v1379_v8, %v1200_v4  ;;  %v1071_v11 = vpop.f32.mrb[13].mxu0 }
 0xbe4   :  { %v1072_v12 = vadd.f32 %v1200_v4, %v1071_v11 }
 0xbe5   :  { %v1083_v14 = vadd.f32 %v1081_v10, %v1077_v9 }
 0xbe6   :  { %v1082_v13 = vadd.f32 %v1080_v6, %v1072_v12 }
 0xbe8   :  { %1388 = vmatprep.mubr.msk.f32.mxu1 %vm47_vm0, %v1082_v13 }
 0xbe9   :  { %1389 = vmatmul.mubr.msk.f32.vlgmr.msra.gmra.mrb[10].mxu1 %vm47_vm0, %v1083_v14 }
 0xcbc   :  { %v1390_v16 = vpop.f32.mrb[10].mxu1 }
 0xcbd   :  { %v1173_v17 = vadd.f32 %v1390_v16, %v1203_v15  ;;  %v1167_v18 = vpop.f32.mrb[11].mxu1 }
 0xcbe   :  { %v1168_v5 = vadd.f32 %v1203_v15, %v1167_v18 }
 0xcbf   :  { %1177 = vst [vmem:[%s1708_s9 + $0x8] sm:$0xff] %v1173_v17 }
 0xcc0   :  { %1176 = vst [vmem:[%s1708_s9] sm:$0xff] %v1168_v5 }

</bundles_post_ra>
